<compile_context>
chip_gen: v6e
topology: v6e:2x2x1
jax: 0.10.0
libtpu: 0.0.40
codegen_flags: <defaults>
</compile_context>

<pallas_src>
import jax
import jax.numpy as jnp
from jax.experimental import pallas as pl
from jax.experimental.pallas import tpu as pltpu


def _round_up(x, m):
    return ((x + m - 1) // m) * m


def mlp_kernel(x_ref, w1_ref, b1_ref, w2_ref, b2_ref, o_ref):
    # First linear layer on the MXU, f32 accumulation.
    w1 = w1_ref[...]
    h = jnp.dot(x_ref[...].astype(w1.dtype), w1,
                preferred_element_type=jnp.float32)
    # Bias + ReLU in f32 on the VPU (b1 is (1, H) -> row broadcast).
    h = jnp.maximum(h + b1_ref[...], 0.0)
    # Second linear layer on the MXU; h is cast exactly once to the weight dtype.
    w2 = w2_ref[...]
    y = jnp.dot(h.astype(w2.dtype), w2, preferred_element_type=jnp.float32)
    o_ref[...] = (y + b2_ref[...]).astype(o_ref.dtype)


def prepare_params(w1, b1, w2, b2, *, weight_dtype=jnp.bfloat16):
    """One-time parameter preprocessing (hoisted out of the forward path).

    w1: (in_dim, H)   b1: (H,)
    w2: (H, out_dim)  b2: (out_dim,)
    """
    H = w1.shape[1]
    out_dim = w2.shape[1]
    return (w1.astype(weight_dtype),
            b1.astype(jnp.float32).reshape(1, H),
            w2.astype(weight_dtype),
            b2.astype(jnp.float32).reshape(1, out_dim))


def simple_nn_forward(x, params, *, max_tile_b=2048):
    """Fused MLP forward: relu(x @ W1 + b1) @ W2 + b2.

    x: (B, in_dim) f32; params from prepare_params(). Returns (B, out_dim) in x.dtype.
    """
    w1c, b1r, w2c, b2r = params
    B, in_dim = x.shape
    H = w1c.shape[1]
    out_dim = w2c.shape[1]

    # Batch tiling: multiple of 8 rows, capped so the grid keeps >= 2 steps
    # when B is large enough (megacore sharding on v7x).  Ragged last block is
    # handled by Pallas; compute is row-independent so OOB rows are harmless.
    tile_b = max(8, min(max_tile_b, _round_up(pl.cdiv(B, 2), 8)))
    grid = (pl.cdiv(B, tile_b),)

    cost = pl.CostEstimate(
        flops=2 * B * (in_dim * H + H * out_dim),
        transcendentals=0,
        bytes_accessed=(x.size * x.dtype.itemsize
                        + w1c.size * w1c.dtype.itemsize
                        + w2c.size * w2c.dtype.itemsize
                        + b1r.size * 4 + b2r.size * 4
                        + B * out_dim * x.dtype.itemsize),
    )

    return pl.pallas_call(
        mlp_kernel,
        out_shape=jax.ShapeDtypeStruct((B, out_dim), x.dtype),
        grid=grid,
        in_specs=[
            pl.BlockSpec((tile_b, in_dim), lambda i: (i, 0)),   # x tile
            pl.BlockSpec((in_dim, H), lambda i: (0, 0)),        # w1 (resident)
            pl.BlockSpec((1, H), lambda i: (0, 0)),             # b1 (resident)
            pl.BlockSpec((H, out_dim), lambda i: (0, 0)),       # w2 (resident)
            pl.BlockSpec((1, out_dim), lambda i: (0, 0)),       # b2 (resident)
        ],
        out_specs=pl.BlockSpec((tile_b, out_dim), lambda i: (i, 0)),
        compiler_params=pltpu.CompilerParams(
            dimension_semantics=("parallel",)),                 # megacore on v7x
        cost_estimate=cost,
    )(x, w1c, b1r, w2c, b2r)


def reference_forward(x, w1, b1, w2, b2):
    h = jnp.maximum(x @ w1 + b1, 0.0)
    return h @ w2 + b2


if __name__ == "__main__":
    # Shapes consistent with the module: input_dim=32, hidden_dim=128, output_dim=16.
    batch, input_dim, hidden_dim, output_dim = 8, 32, 128, 16

    key = jax.random.PRNGKey(0)
    kx, kw1, kb1, kw2, kb2, kx2 = jax.random.split(key, 6)

    x = jax.random.normal(kx, (batch, input_dim), dtype=jnp.float32)

    # Deterministic init mimicking nn.Linear's uniform(-1/sqrt(fan_in), +1/sqrt(fan_in)).
    lim1 = 1.0 / jnp.sqrt(input_dim)
    w1 = jax.random.uniform(kw1, (input_dim, hidden_dim), jnp.float32, -lim1, lim1)
    b1 = jax.random.uniform(kb1, (hidden_dim,), jnp.float32, -lim1, lim1)
    lim2 = 1.0 / jnp.sqrt(hidden_dim)
    w2 = jax.random.uniform(kw2, (hidden_dim, output_dim), jnp.float32, -lim2, lim2)
    b2 = jax.random.uniform(kb2, (hidden_dim,), jnp.float32, -lim2, lim2)[:output_dim]

    params_f32 = prepare_params(w1, b1, w2, b2, weight_dtype=jnp.float32)
    params_bf16 = prepare_params(w1, b1, w2, b2, weight_dtype=jnp.bfloat16)

    # --- small batch, f32 weights: exact check vs reference ---
    out = simple_nn_forward(x, params_f32)
    jax.block_until_ready(out)
    ref = reference_forward(x, w1, b1, w2, b2)
    assert out.shape == (batch, output_dim)
    assert jnp.allclose(out, ref, atol=1e-5, rtol=1e-5), "f32 mismatch vs reference"

    # --- larger, non-multiple batch: exercises the ragged batch grid ---
    big_b = 1030
    xb = jax.random.normal(kx2, (big_b, input_dim), dtype=jnp.float32)
    out_b = simple_nn_forward(xb, params_f32)
    jax.block_until_ready(out_b)
    ref_b = reference_forward(xb, w1, b1, w2, b2)
    assert out_b.shape == (big_b, output_dim)
    assert jnp.allclose(out_b, ref_b, atol=1e-4, rtol=1e-4), "tiled f32 mismatch"

    # --- default bf16 weight path (MXU-native, f32 accumulation): looser tolerance ---
    out_bf16 = simple_nn_forward(xb, params_bf16)
    jax.block_until_ready(out_bf16)
    assert out_bf16.shape == (big_b, output_dim)
    assert jnp.allclose(out_bf16, ref_b, atol=2e-2, rtol=2e-2), "bf16 mismatch"

    print("KERNEL_OK")
</pallas_src>

<mosaic_0001>
module attributes {stable_mosaic.version = 11 : i64} {
  func.func @mlp_kernel(%arg0: i32, %arg1: memref<8x32xf32, #tpu.memory_space<vmem>>, %arg2: memref<32x128xf32, #tpu.memory_space<vmem>>, %arg3: memref<1x128xf32, #tpu.memory_space<vmem>>, %arg4: memref<128x16xf32, #tpu.memory_space<vmem>>, %arg5: memref<1x16xf32, #tpu.memory_space<vmem>>, %arg6: memref<8x16xf32, #tpu.memory_space<vmem>>) attributes {dimension_semantics = [#tpu.dimension_semantics<parallel>], iteration_bounds = array<i64: 1>, scalar_prefetch = 0 : i64, scratch_operands = 0 : i64, tpu.core_type = #tpu.core_type<tc>, window_params = [{transform_indices = @transform_0, window_bounds = array<i64: 8, 32>}, {pipeline_mode = #tpu.pipeline_mode<synchronous>, transform_indices = @transform_1, window_bounds = array<i64: 32, 128>}, {pipeline_mode = #tpu.pipeline_mode<synchronous>, transform_indices = @transform_2, window_bounds = array<i64: 1, 128>}, {pipeline_mode = #tpu.pipeline_mode<synchronous>, transform_indices = @transform_3, window_bounds = array<i64: 128, 16>}, {pipeline_mode = #tpu.pipeline_mode<synchronous>, transform_indices = @transform_4, window_bounds = array<i64: 1, 16>}, {transform_indices = @transform_5, window_bounds = array<i64: 8, 16>}]} {
    %c0 = arith.constant 0 : index
    %c0_0 = arith.constant 0 : index
    %0 = vector.load %arg2[%c0, %c0_0] : memref<32x128xf32, #tpu.memory_space<vmem>>, vector<32x128xf32>
    %c0_1 = arith.constant 0 : index
    %c0_2 = arith.constant 0 : index
    %1 = vector.load %arg1[%c0_1, %c0_2] : memref<8x32xf32, #tpu.memory_space<vmem>>, vector<8x32xf32>
    %cst = arith.constant dense<0.000000e+00> : vector<8x128xf32>
    %2 = tpu.matmul %1, %0, %cst {dimension_numbers = #tpu.dot_dimension_numbers<[1], [0], [0], [1], [0, 0, 1, 1], [], []>} : vector<8x32xf32>, vector<32x128xf32>, vector<8x128xf32> -> vector<8x128xf32>
    %c0_3 = arith.constant 0 : index
    %c0_4 = arith.constant 0 : index
    %3 = vector.load %arg3[%c0_3, %c0_4] : memref<1x128xf32, #tpu.memory_space<vmem>>, vector<1x128xf32>
    %4 = vector.broadcast %3 : vector<1x128xf32> to vector<8x128xf32>
    %5 = arith.addf %2, %4 : vector<8x128xf32>
    %cst_5 = arith.constant 0.000000e+00 : f32
    %6 = vector.broadcast %cst_5 : f32 to vector<8x128xf32>
    %7 = arith.maximumf %5, %6 : vector<8x128xf32>
    %c0_6 = arith.constant 0 : index
    %c0_7 = arith.constant 0 : index
    %8 = vector.load %arg4[%c0_6, %c0_7] : memref<128x16xf32, #tpu.memory_space<vmem>>, vector<128x16xf32>
    %cst_8 = arith.constant dense<0.000000e+00> : vector<8x16xf32>
    %9 = tpu.matmul %7, %8, %cst_8 {dimension_numbers = #tpu.dot_dimension_numbers<[1], [0], [0], [1], [0, 0, 1, 1], [], []>} : vector<8x128xf32>, vector<128x16xf32>, vector<8x16xf32> -> vector<8x16xf32>
    %c0_9 = arith.constant 0 : index
    %c0_10 = arith.constant 0 : index
    %10 = vector.load %arg5[%c0_9, %c0_10] : memref<1x16xf32, #tpu.memory_space<vmem>>, vector<1x16xf32>
    %11 = vector.broadcast %10 : vector<1x16xf32> to vector<8x16xf32>
    %12 = arith.addf %9, %11 : vector<8x16xf32>
    %c0_11 = arith.constant 0 : index
    %c0_12 = arith.constant 0 : index
    %13 = vector.load %arg6[%c0_11, %c0_12] : memref<8x16xf32, #tpu.memory_space<vmem>>, vector<8x16xf32>
    tpu.vector_store %arg6[%c0_11, %c0_12], %12 {strides = array<i32>} : memref<8x16xf32, #tpu.memory_space<vmem>>, vector<8x16xf32>,
    return
  }
  func.func @transform_0(%arg0: i32) -> (i32, i32) {
    %c0_i32 = arith.constant 0 : i32
    %c0_i32_0 = arith.constant 0 : i32
    return %arg0, %c0_i32 : i32, i32
  }
  func.func @transform_1(%arg0: i32) -> (i32, i32) {
    %c0_i32 = arith.constant 0 : i32
    %c0_i32_0 = arith.constant 0 : i32
    %c0_i32_1 = arith.constant 0 : i32
    return %c0_i32, %c0_i32_0 : i32, i32
  }
  func.func @transform_2(%arg0: i32) -> (i32, i32) {
    %c0_i32 = arith.constant 0 : i32
    %c0_i32_0 = arith.constant 0 : i32
    %c0_i32_1 = arith.constant 0 : i32
    return %c0_i32, %c0_i32_0 : i32, i32
  }
  func.func @transform_3(%arg0: i32) -> (i32, i32) {
    %c0_i32 = arith.constant 0 : i32
    %c0_i32_0 = arith.constant 0 : i32
    %c0_i32_1 = arith.constant 0 : i32
    return %c0_i32, %c0_i32_0 : i32, i32
  }
  func.func @transform_4(%arg0: i32) -> (i32, i32) {
    %c0_i32 = arith.constant 0 : i32
    %c0_i32_0 = arith.constant 0 : i32
    %c0_i32_1 = arith.constant 0 : i32
    return %c0_i32, %c0_i32_0 : i32, i32
  }
  func.func @transform_5(%arg0: i32) -> (i32, i32) {
    %c0_i32 = arith.constant 0 : i32
    %c0_i32_0 = arith.constant 0 : i32
    return %arg0, %c0_i32 : i32, i32
  }
}

</mosaic_0001>

<bundles_post_ra>
// kernel: tpu_custom_call.1
= control target key start
LH: loop header
LB: loop body
LE: loop exit
PB: predicated region body
PF: predicated region fallthrough
CT: control target
= control target key end

     0   :  { %v313_v1 = vmov 0.0   ;;  %vm314_vm0 = vmmov 0   ;;  %vm33_vm1 = vcmask 261120   ;;  %s442_s0 = inlined_call_operand.vmem [shape: f32[8,32], index: 0, kind: input, shape index: {}]   ;;  %s443_s1 = inlined_call_operand.vmem [shape: f32[32,128], index: 1, kind: input, shape index: {}]   ;;  %s444_s2 = inlined_call_operand.vmem [shape: f32[1,128], index: 2, kind: input, shape index: {}]   ;;  %s445_s3 = inlined_call_operand.vmem [shape: f32[128,16], index: 3, kind: input, shape index: {}]   ;;  %s446_s4 = inlined_call_operand.vmem [shape: f32[1,16], index: 4, kind: input, shape index: {}]   ;;  %s447_s5 = inlined_call_operand.hbm [shape: f32[8,16], index: 5, kind: output, shape index: {}]  }
   0x1   :  { %v24_v0 = vld [vmem:[%s443_s1 + $0x18] sm:$0xff]  ;;  %242 = vmatprep.subr.mxu0 %v313_v1  ;;  %v23_v2 = vld [vmem:[%s443_s1 + $0x10] sm:$0xff]  ;;  %250 = vmatprep.mubr.msk.f32.mxu0 %vm314_vm0, %v313_v1  ;;  %v22_v5 = vld [vmem:[%s443_s1 + $0x8] sm:$0xff] }
   0x2   :  { %v123_v3 = vld [vmem:[%s445_s3 + $0x78] sm:$0xff]  ;;  %243 = vmatpush3.msra.mxu0 %v24_v0  ;;  %253 = vmatprep.subr.mxu1 %v313_v1  ;;  %v122_v4 = vld [vmem:[%s445_s3 + $0x70] sm:$0xff]  ;;  %v121_v6 = vld [vmem:[%s445_s3 + $0x68] sm:$0xff] }
   0x3   :  { %244 = vmatprep.subr.mxu0 %v313_v1  ;;  %254 = vmatpush3.msra.mxu1 %v123_v3  ;;  %v21_v7 = vld [vmem:[%s443_s1] sm:$0xff] }
   0x4   :  { %245 = vmatpush3.msra.mxu0 %v23_v2  ;;  %255 = vmatprep.subr.mxu1 %v313_v1  ;;  %v25_v8 = vld [vmem:[%s442_s0] sm:$0xff] }
   0x5   :  { %246 = vmatprep.subr.mxu0 %v313_v1  ;;  %256 = vmatpush3.msra.mxu1 %v122_v4  ;;  %v120_v9 = vld [vmem:[%s445_s3 + $0x60] sm:$0xff] }
   0x6   :  { %247 = vmatpush3.msra.mxu0 %v22_v5  ;;  %257 = vmatprep.subr.mxu1 %v313_v1 }
   0x7   :  { %10 = vsyncpa [#allocation3], 0  ;;  %248 = vmatprep.subr.mxu0 %v313_v1  ;;  %258 = vmatpush3.msra.mxu1 %v121_v6  ;;  %v119_v10 = vld [vmem:[%s445_s3 + $0x58] sm:$0xff]  ;;  %v118_v11 = vld [vmem:[%s445_s3 + $0x50] sm:$0xff]  ;;  %s315_s11 = smov [#allocation2]   ;;  %vm201_vm2 = vcmask 130048  }
   0x8   :  { %249 = vmatpush3.msra.mxu0 %v21_v7  ;;  %259 = vmatprep.subr.mxu1 %v313_v1  ;;  %v117_v12 = vld [vmem:[%s445_s3 + $0x48] sm:$0xff]  ;;  %v116_v13 = vld [vmem:[%s445_s3 + $0x40] sm:$0xff]  ;;  %v115_v14 = vld [vmem:[%s445_s3 + $0x38] sm:$0xff]  ;;  %s209_s0 = sshll.u32 %s315_s11, 4  ;;  %s210_s0 = int_to_ptr.vmem [resolvable:$true] %s209_s0 }
   0x9   :  { %251 = vmatmul.mubr.msk.f32.vlgmr.msra.gmra.mxu0 %vm33_vm1, %v25_v8  ;;  %260 = vmatpush3.msra.mxu1 %v120_v9  ;;  %v114_v15 = vld [vmem:[%s445_s3 + $0x30] sm:$0xff]  ;;  %v113_v16 = vld [vmem:[%s445_s3 + $0x28] sm:$0xff]  ;;  %v112_v17 = vld [vmem:[%s445_s3 + $0x20] sm:$0xff]  ;;  %p296_p1 = scmp.lt.s32.totalorder %s210_s0, %s210_s0 }
   0xa   :  { %261 = vmatprep.subr.mxu1 %v313_v1  ;;  %285 = vmatprep.mubr.msk.f32.mxu1 %vm314_vm0, %v313_v1  ;;  %v111_v18 = vld [vmem:[%s445_s3 + $0x18] sm:$0xff]  ;;  %v110_v19 = vld [vmem:[%s445_s3 + $0x10] sm:$0xff]  ;;  %v109_v20 = vld [vmem:[%s445_s3 + $0x8] sm:$0xff] }
   0xb   :  { %262 = vmatpush3.msra.mxu1 %v119_v10  ;;  %v108_v21 = vld [vmem:[%s445_s3] sm:$0xff]  ;;  %s291_s3 = scalar_lea.vmem %s210_s0, 128 }
   0xc   :  { %263 = vmatprep.subr.mxu1 %v313_v1  ;;  %v217_v22 = vld [vmem:[%s444_s2] ss:$0 sm:$0xff]  ;;  %p292_p0 = scmp.ne.s32.totalorder %s210_s0, %s291_s3  ;;  %p297_p2 = scmp.lt.s32.totalorder %s291_s3, %s291_s3 }
   0xd   :  { %264 = vmatpush3.msra.mxu1 %v118_v11  ;;  %v219_v27 = vld [vmem:[%s446_s4] ss:$0 sm:$0xff] }
   0xe   :  { %265 = vmatprep.subr.mxu1 %v313_v1  ;;  %p298_p3 = por %p297_p2, %p296_p1 }
   0xf   :  { %266 = vmatpush3.msra.mxu1 %v117_v12 }
  0x10   :  { %267 = vmatprep.subr.mxu1 %v313_v1  ;;  %p299_p4 = pnand %p298_p3, %p292_p0 }
  0x11   :  { %268 = vmatpush3.msra.mxu1 %v116_v13 }
  0x12   :  { %269 = vmatprep.subr.mxu1 %v313_v1 }
  0x13   :  { %270 = vmatpush3.msra.mxu1 %v115_v14 }
  0x14   :  { %271 = vmatprep.subr.mxu1 %v313_v1 }
  0x15   :  { %272 = vmatpush3.msra.mxu1 %v114_v15 }
  0x16   :  { %273 = vmatprep.subr.mxu1 %v313_v1 }
  0x17   :  { %274 = vmatpush3.msra.mxu1 %v113_v16 }
  0x18   :  { %275 = vmatprep.subr.mxu1 %v313_v1 }
  0x19   :  { %276 = vmatpush3.msra.mxu1 %v112_v17 }
  0x1a   :  { %277 = vmatprep.subr.mxu1 %v313_v1 }
  0x1b   :  { %278 = vmatpush3.msra.mxu1 %v111_v18 }
  0x1c   :  { %279 = vmatprep.subr.mxu1 %v313_v1 }
  0x1d   :  { %280 = vmatpush3.msra.mxu1 %v110_v19 }
  0x1e   :  { %281 = vmatprep.subr.mxu1 %v313_v1 }
  0x1f   :  { %282 = vmatpush3.msra.mxu1 %v109_v20 }
  0x20   :  { %283 = vmatprep.subr.mxu1 %v313_v1 }
  0x21   :  { %284 = vmatpush3.msra.mxu1 %v108_v21 }
  0xc9   :  { %v103_v23 = vpop.f32.mrf.mxu0 }
  0xca   :  { %v104_v24 = vadd.f32 %v217_v22, %v103_v23 }
  0xcb   :  { %v252_v25 = vpop.f32.mrf.mxu0 }
  0xcc   :  { %v107_v26 = vmax.f32 %v104_v24, 0.0 }
  0xce   :  { %286 = vmatmul.mubr.f32.vlgmr.msra.gmra.mxu1 %v107_v26 }
 0x18e   :  { %v197_v28 = vpop.f32.mrf.mxu1 }
 0x18f   :  { %v198_v29 = vadd.f32 %v219_v27, %v197_v28 }
 0x190   :  { %v287_v30 = vpop.f32.mrf.mxu1 }
 0x191   :  { %202 = vst.msk [vmem:[#allocation2] sm:$0xff] %vm201_vm2, %v198_v29 }
 0x192   :  { %302 = shalt.err (!%p299_p4)
}
 0x193   :  { %212 = dma.vmem_to_hbm [thread:$0]  %s210_s0, 128, %s447_s5, [#allocation3]  }
 0x194   :  { %311 = dma.done.wait [#allocation3], 128  }
 0x195   :  { %312 = vsyncadd [#allocation3], 4294967168 }
 0x196   :  { %216 = vsyncpa [#allocation3], 1 }

</bundles_post_ra>
